<compile_context>
chip_gen: v7x
topology: tpu7x:2x2x1
jax: 0.10.0
libtpu: 0.0.40
codegen_flags: <defaults>
</compile_context>

<pallas_src>
import functools

import jax
import jax.numpy as jnp
import numpy as np
from jax.experimental import pallas as pl
from jax.experimental.pallas import tpu as pltpu

LANE = 128
SUBLANE = 8
TARGET_TILE_B = 512   # ~85% of HBM roofline per measured Pallas tiling data


def _round_up(v, m):
    return ((v + m - 1) // m) * m


def _pad2(a, rows, cols):
    r, c = a.shape
    return jnp.pad(a, ((0, rows - r), (0, cols - c)))


def _pick_tile_b(B):
    """Batch tile: big enough to amortize ~0.35us/grid-step overhead, clamped so
    tail padding stays small, and an even step count (v7x TC balance) when more
    than one step is needed."""
    b8 = _round_up(B, SUBLANE)
    if b8 <= TARGET_TILE_B:
        return b8, b8                       # single step, minimal padding
    steps = pl.cdiv(b8, TARGET_TILE_B)
    if steps % 2:
        steps += 1                          # keep the 2 TensorCores balanced
    tile_b = _round_up(pl.cdiv(b8, steps), SUBLANE)
    return tile_b, tile_b * steps


def ae_kernel(x_ref, we_ref, be_ref, wm_ref, bm_ref, wd_ref, bd_ref,
              xt_ref, zt_ref):
    cdt = we_ref.dtype  # compute dtype (bf16); accumulation is f32 throughout
    # encoder: Linear + ReLU
    h = jnp.dot(x_ref[...], we_ref[...],
                preferred_element_type=jnp.float32) + be_ref[...]
    h = jnp.maximum(h, 0.0)
    # regularize: map_latent Linear
    z = jnp.dot(h.astype(cdt), wm_ref[...],
                preferred_element_type=jnp.float32) + bm_ref[...]
    zt_ref[...] = z
    # decoder: Linear
    xt = jnp.dot(z.astype(cdt), wd_ref[...],
                 preferred_element_type=jnp.float32) + bd_ref[...]
    xt_ref[...] = xt


def xavier_uniform(key, fan_in, fan_out, dtype=jnp.float32):
    # Matches torch.nn.init.xavier_uniform_ on a (fan_out, fan_in) weight;
    # stored pre-transposed as (in, out) so the kernel computes y = x @ W + b.
    bound = np.sqrt(6.0 / (fan_in + fan_out))
    return jax.random.uniform(key, (fan_in, fan_out), dtype=dtype,
                              minval=-bound, maxval=bound)


def make_ae_params(key, d_in, encoder_dims, latent_dims):
    k0, k1, k2 = jax.random.split(key, 3)
    return {
        "w_enc": xavier_uniform(k0, d_in, encoder_dims),
        "b_enc": jnp.full((1, encoder_dims), 0.01, jnp.float32),
        "w_map": xavier_uniform(k1, encoder_dims, latent_dims),
        "b_map": jnp.full((1, latent_dims), 0.01, jnp.float32),
        "w_dec": xavier_uniform(k2, latent_dims, d_in),
        "b_dec": jnp.full((1, d_in), 0.01, jnp.float32),
    }


def prepare_ae_params(params, compute_dtype=jnp.bfloat16):
    """One-time parameter prep (hoisted out of the hot forward path):
    zero-pad feature dims to lane (128) multiples and cast weights to the MXU
    compute dtype.  Biases stay f32 (added to the f32 accumulator)."""
    d_in, enc = params["w_enc"].shape
    lat = params["w_map"].shape[1]
    d_pad = _round_up(d_in, LANE)
    e_pad = _round_up(enc, LANE)
    l_pad = _round_up(lat, LANE)
    return {
        "w_enc": _pad2(params["w_enc"], d_pad, e_pad).astype(compute_dtype),
        "b_enc": _pad2(params["b_enc"], 1, e_pad).astype(jnp.float32),
        "w_map": _pad2(params["w_map"], e_pad, l_pad).astype(compute_dtype),
        "b_map": _pad2(params["b_map"], 1, l_pad).astype(jnp.float32),
        "w_dec": _pad2(params["w_dec"], l_pad, d_pad).astype(compute_dtype),
        "b_dec": _pad2(params["b_dec"], 1, d_pad).astype(jnp.float32),
    }


def _resident_spec(shape, single_buffer):
    """Constant-index-map operand: stays VMEM-resident across grid steps.
    Single-buffer it when supported to halve its VMEM footprint."""
    idx = lambda i: (0, 0)
    if single_buffer:
        return pl.BlockSpec(shape, idx, pipeline_mode=pl.Buffered(1))
    return pl.BlockSpec(shape, idx)


@functools.partial(jax.jit, static_argnames=("latent_dims", "single_buffer"))
def _ae_forward_impl(x, prepped, latent_dims, single_buffer):
    B, d_in = x.shape
    d_pad, e_pad = prepped["w_enc"].shape
    l_pad = prepped["w_map"].shape[1]
    compute_dtype = prepped["w_enc"].dtype
    cbytes = jnp.dtype(compute_dtype).itemsize

    tile_b, b_pad = _pick_tile_b(B)
    steps = b_pad // tile_b

    # Only x is padded/cast per call; weights were prepped once.
    xp = _pad2(x, b_pad, d_pad).astype(compute_dtype)

    # Derive an explicit VMEM budget (avoid the 16/32 MiB default scoped limit,
    # stay under v7x's 64 MiB physical VMEM).
    wbuf = 1 if single_buffer else 2
    footprint = (
        2 * tile_b * d_pad * cbytes                                   # x tile (dbl buf)
        + 2 * tile_b * (d_pad + l_pad) * 4                            # out tiles (dbl buf)
        + wbuf * (d_pad * e_pad + e_pad * l_pad + l_pad * d_pad) * cbytes  # weights
        + wbuf * SUBLANE * (e_pad + l_pad + d_pad) * 4                # biases (sublane pad)
        + tile_b * (e_pad + l_pad) * 4                                # h / z intermediates
    )
    vmem_limit = int(min(64 * 1024 * 1024, max(2 * footprint, 16 * 1024 * 1024)))

    xt_pad, zt_pad = pl.pallas_call(
        ae_kernel,
        out_shape=(
            jax.ShapeDtypeStruct((b_pad, d_pad), jnp.float32),   # x_tilde (padded)
            jax.ShapeDtypeStruct((b_pad, l_pad), jnp.float32),   # z_tilde (padded)
        ),
        grid=(steps,),
        in_specs=[
            pl.BlockSpec((tile_b, d_pad), lambda i: (i, 0)),     # x tile (pipelined)
            _resident_spec((d_pad, e_pad), single_buffer),       # w_enc
            _resident_spec((1, e_pad), single_buffer),           # b_enc
            _resident_spec((e_pad, l_pad), single_buffer),       # w_map
            _resident_spec((1, l_pad), single_buffer),           # b_map
            _resident_spec((l_pad, d_pad), single_buffer),       # w_dec
            _resident_spec((1, d_pad), single_buffer),           # b_dec
        ],
        out_specs=(
            pl.BlockSpec((tile_b, d_pad), lambda i: (i, 0)),
            pl.BlockSpec((tile_b, l_pad), lambda i: (i, 0)),
        ),
        compiler_params=pltpu.CompilerParams(
            dimension_semantics=("parallel",),     # shard batch steps across TCs
            vmem_limit_bytes=vmem_limit),
    )(xp, prepped["w_enc"], prepped["b_enc"], prepped["w_map"],
      prepped["b_map"], prepped["w_dec"], prepped["b_dec"])

    # Un-pad only when needed; at production-aligned dims these are no-ops.
    x_tilde = xt_pad if (b_pad == B and d_pad == d_in) else xt_pad[:B, :d_in]
    z_tilde = (zt_pad if (b_pad == B and l_pad == latent_dims)
               else zt_pad[:B, :latent_dims])
    z_loss = jnp.float32(0.0)   # torch.zeros(B).mean() == 0, constant
    return x_tilde, z_tilde, z_loss


_SINGLE_BUFFER_OK = hasattr(pl, "Buffered")


def ae_forward(x, prepped, latent_dims):
    """Forward pass. Tries single-buffered resident weights first; falls back to
    default double buffering if this JAX build rejects pipeline_mode."""
    global _SINGLE_BUFFER_OK
    if _SINGLE_BUFFER_OK:
        try:
            return _ae_forward_impl(x, prepped, latent_dims=latent_dims,
                                    single_buffer=True)
        except Exception:
            _SINGLE_BUFFER_OK = False
    return _ae_forward_impl(x, prepped, latent_dims=latent_dims,
                            single_buffer=False)


def ae_forward_ref(x, params):
    h = jnp.maximum(x @ params["w_enc"] + params["b_enc"], 0.0)
    z = h @ params["w_map"] + params["b_map"]
    xt = z @ params["w_dec"] + params["b_dec"]
    return xt, z, jnp.float32(0.0)


if __name__ == "__main__":
    # Small shapes consistent with the module: flattened input of 64 features,
    # encoder_dims=32, latent_dims=16, batch=8.
    B, D_IN, ENC_DIMS, LAT_DIMS = 8, 64, 32, 16

    key = jax.random.PRNGKey(0)
    kx, kp = jax.random.split(key)
    x = jax.random.normal(kx, (B, D_IN), jnp.float32)
    params = make_ae_params(kp, D_IN, ENC_DIMS, LAT_DIMS)
    prepped = prepare_ae_params(params)            # one-time pad + bf16 cast

    x_tilde, z_tilde, z_loss = ae_forward(x, prepped, LAT_DIMS)
    jax.block_until_ready((x_tilde, z_tilde, z_loss))

    # bf16 operands / f32 accumulation vs pure-f32 reference -> loosened tolerance.
    xt_ref, zt_ref, _ = ae_forward_ref(x, params)
    np.testing.assert_allclose(np.asarray(x_tilde), np.asarray(xt_ref),
                               rtol=5e-2, atol=6e-2)
    np.testing.assert_allclose(np.asarray(z_tilde), np.asarray(zt_ref),
                               rtol=5e-2, atol=6e-2)
    assert float(z_loss) == 0.0
    assert x_tilde.shape == (B, D_IN) and z_tilde.shape == (B, LAT_DIMS)

    # Larger, non-multiple batch: exercises adaptive tile sizing (one 304-row
    # step instead of padding to 512) and the padded-row discard.
    xb = jax.random.normal(jax.random.PRNGKey(1), (300, D_IN), jnp.float32)
    xt2, zt2, zl2 = ae_forward(xb, prepped, LAT_DIMS)
    jax.block_until_ready((xt2, zt2, zl2))
    xt2_ref, zt2_ref, _ = ae_forward_ref(xb, params)
    np.testing.assert_allclose(np.asarray(xt2), np.asarray(xt2_ref),
                               rtol=5e-2, atol=6e-2)
    np.testing.assert_allclose(np.asarray(zt2), np.asarray(zt2_ref),
                               rtol=5e-2, atol=6e-2)
    assert float(zl2) == 0.0

    print("KERNEL_OK")
</pallas_src>

<mosaic_0001>
module attributes {stable_mosaic.version = 11 : i64} {
  func.func @ae_kernel(%arg0: i32, %arg1: memref<8x128xbf16, #tpu.memory_space<vmem>>, %arg2: memref<128x128xbf16, #tpu.memory_space<vmem>>, %arg3: memref<1x128xf32, #tpu.memory_space<vmem>>, %arg4: memref<128x128xbf16, #tpu.memory_space<vmem>>, %arg5: memref<1x128xf32, #tpu.memory_space<vmem>>, %arg6: memref<128x128xbf16, #tpu.memory_space<vmem>>, %arg7: memref<1x128xf32, #tpu.memory_space<vmem>>, %arg8: memref<8x128xf32, #tpu.memory_space<vmem>>, %arg9: memref<8x128xf32, #tpu.memory_space<vmem>>) attributes {dimension_semantics = [#tpu.dimension_semantics<parallel>], iteration_bounds = array<i64: 1>, scalar_prefetch = 0 : i64, scratch_operands = 0 : i64, tpu.core_type = #tpu.core_type<tc>, window_params = [{transform_indices = @transform_0, window_bounds = array<i64: 8, 128>}, {pipeline_mode = #tpu.pipeline_mode<synchronous>, transform_indices = @transform_1, window_bounds = array<i64: 128, 128>}, {pipeline_mode = #tpu.pipeline_mode<synchronous>, transform_indices = @transform_2, window_bounds = array<i64: 1, 128>}, {pipeline_mode = #tpu.pipeline_mode<synchronous>, transform_indices = @transform_3, window_bounds = array<i64: 128, 128>}, {pipeline_mode = #tpu.pipeline_mode<synchronous>, transform_indices = @transform_4, window_bounds = array<i64: 1, 128>}, {pipeline_mode = #tpu.pipeline_mode<synchronous>, transform_indices = @transform_5, window_bounds = array<i64: 128, 128>}, {pipeline_mode = #tpu.pipeline_mode<synchronous>, transform_indices = @transform_6, window_bounds = array<i64: 1, 128>}, {transform_indices = @transform_7, window_bounds = array<i64: 8, 128>}, {transform_indices = @transform_8, window_bounds = array<i64: 8, 128>}]} {
    %c0 = arith.constant 0 : index
    %c0_0 = arith.constant 0 : index
    %0 = vector.load %arg1[%c0, %c0_0] : memref<8x128xbf16, #tpu.memory_space<vmem>>, vector<8x128xbf16>
    %c0_1 = arith.constant 0 : index
    %c0_2 = arith.constant 0 : index
    %1 = vector.load %arg2[%c0_1, %c0_2] : memref<128x128xbf16, #tpu.memory_space<vmem>>, vector<128x128xbf16>
    %cst = arith.constant dense<0.000000e+00> : vector<8x128xf32>
    %2 = tpu.matmul %0, %1, %cst {dimension_numbers = #tpu.dot_dimension_numbers<[1], [0], [0], [1], [0, 0, 1, 1], [], []>} : vector<8x128xbf16>, vector<128x128xbf16>, vector<8x128xf32> -> vector<8x128xf32>
    %c0_3 = arith.constant 0 : index
    %c0_4 = arith.constant 0 : index
    %3 = vector.load %arg3[%c0_3, %c0_4] : memref<1x128xf32, #tpu.memory_space<vmem>>, vector<1x128xf32>
    %4 = vector.broadcast %3 : vector<1x128xf32> to vector<8x128xf32>
    %5 = arith.addf %2, %4 : vector<8x128xf32>
    %cst_5 = arith.constant 0.000000e+00 : f32
    %6 = vector.broadcast %cst_5 : f32 to vector<8x128xf32>
    %7 = arith.maximumf %5, %6 : vector<8x128xf32>
    %8 = arith.truncf %7 : vector<8x128xf32> to vector<8x128xbf16>
    %c0_6 = arith.constant 0 : index
    %c0_7 = arith.constant 0 : index
    %9 = vector.load %arg4[%c0_6, %c0_7] : memref<128x128xbf16, #tpu.memory_space<vmem>>, vector<128x128xbf16>
    %cst_8 = arith.constant dense<0.000000e+00> : vector<8x128xf32>
    %10 = tpu.matmul %8, %9, %cst_8 {dimension_numbers = #tpu.dot_dimension_numbers<[1], [0], [0], [1], [0, 0, 1, 1], [], []>} : vector<8x128xbf16>, vector<128x128xbf16>, vector<8x128xf32> -> vector<8x128xf32>
    %c0_9 = arith.constant 0 : index
    %c0_10 = arith.constant 0 : index
    %11 = vector.load %arg5[%c0_9, %c0_10] : memref<1x128xf32, #tpu.memory_space<vmem>>, vector<1x128xf32>
    %12 = vector.broadcast %11 : vector<1x128xf32> to vector<8x128xf32>
    %13 = arith.addf %10, %12 : vector<8x128xf32>
    %c0_11 = arith.constant 0 : index
    %c0_12 = arith.constant 0 : index
    %14 = vector.load %arg9[%c0_11, %c0_12] : memref<8x128xf32, #tpu.memory_space<vmem>>, vector<8x128xf32>
    tpu.vector_store %arg9[%c0_11, %c0_12], %13 {strides = array<i32>} : memref<8x128xf32, #tpu.memory_space<vmem>>, vector<8x128xf32>,
    %15 = arith.truncf %13 : vector<8x128xf32> to vector<8x128xbf16>
    %c0_13 = arith.constant 0 : index
    %c0_14 = arith.constant 0 : index
    %16 = vector.load %arg6[%c0_13, %c0_14] : memref<128x128xbf16, #tpu.memory_space<vmem>>, vector<128x128xbf16>
    %cst_15 = arith.constant dense<0.000000e+00> : vector<8x128xf32>
    %17 = tpu.matmul %15, %16, %cst_15 {dimension_numbers = #tpu.dot_dimension_numbers<[1], [0], [0], [1], [0, 0, 1, 1], [], []>} : vector<8x128xbf16>, vector<128x128xbf16>, vector<8x128xf32> -> vector<8x128xf32>
    %c0_16 = arith.constant 0 : index
    %c0_17 = arith.constant 0 : index
    %18 = vector.load %arg7[%c0_16, %c0_17] : memref<1x128xf32, #tpu.memory_space<vmem>>, vector<1x128xf32>
    %19 = vector.broadcast %18 : vector<1x128xf32> to vector<8x128xf32>
    %20 = arith.addf %17, %19 : vector<8x128xf32>
    %c0_18 = arith.constant 0 : index
    %c0_19 = arith.constant 0 : index
    %21 = vector.load %arg8[%c0_18, %c0_19] : memref<8x128xf32, #tpu.memory_space<vmem>>, vector<8x128xf32>
    tpu.vector_store %arg8[%c0_18, %c0_19], %20 {strides = array<i32>} : memref<8x128xf32, #tpu.memory_space<vmem>>, vector<8x128xf32>,
    return
  }
  func.func @transform_0(%arg0: i32) -> (i32, i32) {
    %c0_i32 = arith.constant 0 : i32
    %c0_i32_0 = arith.constant 0 : i32
    return %arg0, %c0_i32 : i32, i32
  }
  func.func @transform_1(%arg0: i32) -> (i32, i32) {
    %c0_i32 = arith.constant 0 : i32
    %c0_i32_0 = arith.constant 0 : i32
    %c0_i32_1 = arith.constant 0 : i32
    return %c0_i32, %c0_i32_0 : i32, i32
  }
  func.func @transform_2(%arg0: i32) -> (i32, i32) {
    %c0_i32 = arith.constant 0 : i32
    %c0_i32_0 = arith.constant 0 : i32
    %c0_i32_1 = arith.constant 0 : i32
    return %c0_i32, %c0_i32_0 : i32, i32
  }
  func.func @transform_3(%arg0: i32) -> (i32, i32) {
    %c0_i32 = arith.constant 0 : i32
    %c0_i32_0 = arith.constant 0 : i32
    %c0_i32_1 = arith.constant 0 : i32
    return %c0_i32, %c0_i32_0 : i32, i32
  }
  func.func @transform_4(%arg0: i32) -> (i32, i32) {
    %c0_i32 = arith.constant 0 : i32
    %c0_i32_0 = arith.constant 0 : i32
    %c0_i32_1 = arith.constant 0 : i32
    return %c0_i32, %c0_i32_0 : i32, i32
  }
  func.func @transform_5(%arg0: i32) -> (i32, i32) {
    %c0_i32 = arith.constant 0 : i32
    %c0_i32_0 = arith.constant 0 : i32
    %c0_i32_1 = arith.constant 0 : i32
    return %c0_i32, %c0_i32_0 : i32, i32
  }
  func.func @transform_6(%arg0: i32) -> (i32, i32) {
    %c0_i32 = arith.constant 0 : i32
    %c0_i32_0 = arith.constant 0 : i32
    %c0_i32_1 = arith.constant 0 : i32
    return %c0_i32, %c0_i32_0 : i32, i32
  }
  func.func @transform_7(%arg0: i32) -> (i32, i32) {
    %c0_i32 = arith.constant 0 : i32
    %c0_i32_0 = arith.constant 0 : i32
    return %arg0, %c0_i32 : i32, i32
  }
  func.func @transform_8(%arg0: i32) -> (i32, i32) {
    %c0_i32 = arith.constant 0 : i32
    %c0_i32_0 = arith.constant 0 : i32
    return %arg0, %c0_i32 : i32, i32
  }
}

module attributes {stable_mosaic.version = 11 : i64} {
  func.func @ae_kernel(%arg0: i32, %arg1: memref<8x128xbf16, #tpu.memory_space<vmem>>, %arg2: memref<128x128xbf16, #tpu.memory_space<vmem>>, %arg3: memref<1x128xf32, #tpu.memory_space<vmem>>, %arg4: memref<128x128xbf16, #tpu.memory_space<vmem>>, %arg5: memref<1x128xf32, #tpu.memory_space<vmem>>, %arg6: memref<128x128xbf16, #tpu.memory_space<vmem>>, %arg7: memref<1x128xf32, #tpu.memory_space<vmem>>, %arg8: memref<8x128xf32, #tpu.memory_space<vmem>>, %arg9: memref<8x128xf32, #tpu.memory_space<vmem>>) attributes {dimension_semantics = [#tpu.dimension_semantics<parallel>], iteration_bounds = array<i64: 1>, scalar_prefetch = 0 : i64, scratch_operands = 0 : i64, tpu.core_type = #tpu.core_type<tc>, window_params = [{transform_indices = @transform_0, window_bounds = array<i64: 8, 128>}, {pipeline_mode = #tpu.pipeline_mode<synchronous>, transform_indices = @transform_1, window_bounds = array<i64: 128, 128>}, {pipeline_mode = #tpu.pipeline_mode<synchronous>, transform_indices = @transform_2, window_bounds = array<i64: 1, 128>}, {pipeline_mode = #tpu.pipeline_mode<synchronous>, transform_indices = @transform_3, window_bounds = array<i64: 128, 128>}, {pipeline_mode = #tpu.pipeline_mode<synchronous>, transform_indices = @transform_4, window_bounds = array<i64: 1, 128>}, {pipeline_mode = #tpu.pipeline_mode<synchronous>, transform_indices = @transform_5, window_bounds = array<i64: 128, 128>}, {pipeline_mode = #tpu.pipeline_mode<synchronous>, transform_indices = @transform_6, window_bounds = array<i64: 1, 128>}, {transform_indices = @transform_7, window_bounds = array<i64: 8, 128>}, {transform_indices = @transform_8, window_bounds = array<i64: 8, 128>}]} {
    %c0 = arith.constant 0 : index
    %c0_0 = arith.constant 0 : index
    %0 = vector.load %arg1[%c0, %c0_0] : memref<8x128xbf16, #tpu.memory_space<vmem>>, vector<8x128xbf16>
    %c0_1 = arith.constant 0 : index
    %c0_2 = arith.constant 0 : index
    %1 = vector.load %arg2[%c0_1, %c0_2] : memref<128x128xbf16, #tpu.memory_space<vmem>>, vector<128x128xbf16>
    %cst = arith.constant dense<0.000000e+00> : vector<8x128xf32>
    %2 = tpu.matmul %0, %1, %cst {dimension_numbers = #tpu.dot_dimension_numbers<[1], [0], [0], [1], [0, 0, 1, 1], [], []>} : vector<8x128xbf16>, vector<128x128xbf16>, vector<8x128xf32> -> vector<8x128xf32>
    %c0_3 = arith.constant 0 : index
    %c0_4 = arith.constant 0 : index
    %3 = vector.load %arg3[%c0_3, %c0_4] : memref<1x128xf32, #tpu.memory_space<vmem>>, vector<1x128xf32>
    %4 = vector.broadcast %3 : vector<1x128xf32> to vector<8x128xf32>
    %5 = arith.addf %2, %4 : vector<8x128xf32>
    %cst_5 = arith.constant 0.000000e+00 : f32
    %6 = vector.broadcast %cst_5 : f32 to vector<8x128xf32>
    %7 = arith.maximumf %5, %6 : vector<8x128xf32>
    %8 = arith.truncf %7 : vector<8x128xf32> to vector<8x128xbf16>
    %c0_6 = arith.constant 0 : index
    %c0_7 = arith.constant 0 : index
    %9 = vector.load %arg4[%c0_6, %c0_7] : memref<128x128xbf16, #tpu.memory_space<vmem>>, vector<128x128xbf16>
    %cst_8 = arith.constant dense<0.000000e+00> : vector<8x128xf32>
    %10 = tpu.matmul %8, %9, %cst_8 {dimension_numbers = #tpu.dot_dimension_numbers<[1], [0], [0], [1], [0, 0, 1, 1], [], []>} : vector<8x128xbf16>, vector<128x128xbf16>, vector<8x128xf32> -> vector<8x128xf32>
    %c0_9 = arith.constant 0 : index
    %c0_10 = arith.constant 0 : index
    %11 = vector.load %arg5[%c0_9, %c0_10] : memref<1x128xf32, #tpu.memory_space<vmem>>, vector<1x128xf32>
    %12 = vector.broadcast %11 : vector<1x128xf32> to vector<8x128xf32>
    %13 = arith.addf %10, %12 : vector<8x128xf32>
    %c0_11 = arith.constant 0 : index
    %c0_12 = arith.constant 0 : index
    %14 = vector.load %arg9[%c0_11, %c0_12] : memref<8x128xf32, #tpu.memory_space<vmem>>, vector<8x128xf32>
    tpu.vector_store %arg9[%c0_11, %c0_12], %13 {strides = array<i32>} : memref<8x128xf32, #tpu.memory_space<vmem>>, vector<8x128xf32>,
    %15 = arith.truncf %13 : vector<8x128xf32> to vector<8x128xbf16>
    %c0_13 = arith.constant 0 : index
    %c0_14 = arith.constant 0 : index
    %16 = vector.load %arg6[%c0_13, %c0_14] : memref<128x128xbf16, #tpu.memory_space<vmem>>, vector<128x128xbf16>
    %cst_15 = arith.constant dense<0.000000e+00> : vector<8x128xf32>
    %17 = tpu.matmul %15, %16, %cst_15 {dimension_numbers = #tpu.dot_dimension_numbers<[1], [0], [0], [1], [0, 0, 1, 1], [], []>} : vector<8x128xbf16>, vector<128x128xbf16>, vector<8x128xf32> -> vector<8x128xf32>
    %c0_16 = arith.constant 0 : index
    %c0_17 = arith.constant 0 : index
    %18 = vector.load %arg7[%c0_16, %c0_17] : memref<1x128xf32, #tpu.memory_space<vmem>>, vector<1x128xf32>
    %19 = vector.broadcast %18 : vector<1x128xf32> to vector<8x128xf32>
    %20 = arith.addf %17, %19 : vector<8x128xf32>
    %c0_18 = arith.constant 0 : index
    %c0_19 = arith.constant 0 : index
    %21 = vector.load %arg8[%c0_18, %c0_19] : memref<8x128xf32, #tpu.memory_space<vmem>>, vector<8x128xf32>
    tpu.vector_store %arg8[%c0_18, %c0_19], %20 {strides = array<i32>} : memref<8x128xf32, #tpu.memory_space<vmem>>, vector<8x128xf32>,
    return
  }
  func.func @transform_0(%arg0: i32) -> (i32, i32) {
    %c0_i32 = arith.constant 0 : i32
    %c0_i32_0 = arith.constant 0 : i32
    return %arg0, %c0_i32 : i32, i32
  }
  func.func @transform_1(%arg0: i32) -> (i32, i32) {
    %c0_i32 = arith.constant 0 : i32
    %c0_i32_0 = arith.constant 0 : i32
    %c0_i32_1 = arith.constant 0 : i32
    return %c0_i32, %c0_i32_0 : i32, i32
  }
  func.func @transform_2(%arg0: i32) -> (i32, i32) {
    %c0_i32 = arith.constant 0 : i32
    %c0_i32_0 = arith.constant 0 : i32
    %c0_i32_1 = arith.constant 0 : i32
    return %c0_i32, %c0_i32_0 : i32, i32
  }
  func.func @transform_3(%arg0: i32) -> (i32, i32) {
    %c0_i32 = arith.constant 0 : i32
    %c0_i32_0 = arith.constant 0 : i32
    %c0_i32_1 = arith.constant 0 : i32
    return %c0_i32, %c0_i32_0 : i32, i32
  }
  func.func @transform_4(%arg0: i32) -> (i32, i32) {
    %c0_i32 = arith.constant 0 : i32
    %c0_i32_0 = arith.constant 0 : i32
    %c0_i32_1 = arith.constant 0 : i32
    return %c0_i32, %c0_i32_0 : i32, i32
  }
  func.func @transform_5(%arg0: i32) -> (i32, i32) {
    %c0_i32 = arith.constant 0 : i32
    %c0_i32_0 = arith.constant 0 : i32
    %c0_i32_1 = arith.constant 0 : i32
    return %c0_i32, %c0_i32_0 : i32, i32
  }
  func.func @transform_6(%arg0: i32) -> (i32, i32) {
    %c0_i32 = arith.constant 0 : i32
    %c0_i32_0 = arith.constant 0 : i32
    %c0_i32_1 = arith.constant 0 : i32
    return %c0_i32, %c0_i32_0 : i32, i32
  }
  func.func @transform_7(%arg0: i32) -> (i32, i32) {
    %c0_i32 = arith.constant 0 : i32
    %c0_i32_0 = arith.constant 0 : i32
    return %arg0, %c0_i32 : i32, i32
  }
  func.func @transform_8(%arg0: i32) -> (i32, i32) {
    %c0_i32 = arith.constant 0 : i32
    %c0_i32_0 = arith.constant 0 : i32
    return %arg0, %c0_i32 : i32, i32
  }
}

</mosaic_0001>

<bundles_post_ra>
// kernel: _ae_forward_impl.1
= control target key start
LH: loop header
LB: loop body
LE: loop exit
PB: predicated region body
PF: predicated region fallthrough
CT: control target
= control target key end

     0   :  { %14 = vsyncpa [#allocation3], 0  ;;  %s878_s0 = inlined_call_operand.vmem [shape: bf16[8,128], index: 0, kind: input, shape index: {}]   ;;  %s879_s1 = inlined_call_operand.hbm [shape: bf16[128,128], index: 1, kind: input, shape index: {}]   ;;  %s880_s2 = inlined_call_operand.vmem [shape: f32[1,128], index: 2, kind: input, shape index: {}]   ;;  %s881_s3 = inlined_call_operand.hbm [shape: bf16[128,128], index: 3, kind: input, shape index: {}]   ;;  %s882_s4 = inlined_call_operand.vmem [shape: f32[1,128], index: 4, kind: input, shape index: {}]   ;;  %s883_s5 = inlined_call_operand.hbm [shape: bf16[128,128], index: 5, kind: input, shape index: {}]   ;;  %s884_s6 = inlined_call_operand.vmem [shape: f32[1,128], index: 6, kind: input, shape index: {}]   ;;  %s885_s7 = inlined_call_operand.hbm [shape: f32[8,128], index: 7, kind: output, shape index: {0}]   ;;  %s886_s8 = inlined_call_operand.hbm [shape: f32[8,128], index: 8, kind: output, shape index: {1}]  }
   0x1   :  { %15 = vsyncpa [#allocation6], 0 }
   0x2   :  { %16 = vsyncpa [#allocation4], 0 }
   0x3   :  { %17 = vsyncpa [#allocation10], 0  ;;  %s706_s27 = smov [#allocation5]   ;;  %s707_s29 = smov [#allocation2]  }
   0x4   :  { %s39_s28 = sshll.u32 %s706_s27, 4  ;;  %s25_s30 = sshll.u32 %s707_s29, 4  ;;  %s40_s28 = int_to_ptr.vmem [resolvable:$true] %s39_s28  ;;  %s760_s30 = int_to_ptr.vmem [resolvable:$true] %s25_s30 }
   0x5   :  { %s588_s11 = scalar_lea.hbm %s881_s3, 1024 }
   0x6   :  { %p589_p0 = scmp.ne.s32.totalorder %s881_s3, %s588_s11  ;;  %p592_p1 = scmp.lt.u32.totalorder %s588_s11, %s881_s3 }
   0x8   :  { %p594_p2 = pnand %p592_p1, %p589_p0 }
   0xa   :  { %597 = shalt.err (!%p594_p2)
}
   0xb   :  { %s598_s16 = scalar_lea.vmem %s40_s28, 1024  ;;  %p603_p4 = scmp.lt.s32.totalorder %s40_s28, %s40_s28 }
   0xc   :  { %p599_p3 = scmp.ne.s32.totalorder %s40_s28, %s598_s16  ;;  %p604_p5 = scmp.lt.s32.totalorder %s598_s16, %s598_s16 }
   0xe   :  { %p605_p6 = por %p604_p5, %p603_p4 }
  0x10   :  { %p606_p7 = pnand %p605_p6, %p599_p3 }
  0x12   :  { %609 = shalt.err (!%p606_p7)
}
  0x13   :  { %s708_s17 = smov 64   ;;  %s709_s18 = smov 4  }
  0x14   :  { %45 = dma.hbm_to_vmem [thread:$0]  %s881_s3, 1024, %s40_s28, [#allocation6], %s708_s17, %s708_s17, %s709_s18  }
  0x15   :  { %s610_s23 = scalar_lea.hbm %s879_s1, 1024 }
  0x16   :  { %p611_p8 = scmp.ne.s32.totalorder %s879_s1, %s610_s23  ;;  %p614_p9 = scmp.lt.u32.totalorder %s610_s23, %s879_s1 }
  0x18   :  { %p616_p10 = pnand %p614_p9, %p611_p8 }
  0x1a   :  { %619 = shalt.err (!%p616_p10)
}
  0x1b   :  { %s620_s29 = scalar_lea.vmem %s760_s30, 1024  ;;  %p625_p12 = scmp.lt.s32.totalorder %s760_s30, %s760_s30 }
  0x1c   :  { %p621_p11 = scmp.ne.s32.totalorder %s760_s30, %s620_s29  ;;  %p626_p13 = scmp.lt.s32.totalorder %s620_s29, %s620_s29 }
  0x1e   :  { %p627_p0 = por %p626_p13, %p625_p12 }
  0x20   :  { %p628_p1 = pnand %p627_p0, %p621_p11 }
  0x22   :  { %631 = shalt.err (!%p628_p1)
}
  0x23   :  { %31 = dma.hbm_to_vmem [thread:$0]  %s879_s1, 1024, %s760_s30, [#allocation3], %s708_s17, %s708_s17, %s709_s18  }
  0x24   :  { %s710_s9 = smov [#allocation7]   ;;  %s632_s13 = scalar_lea.hbm %s883_s5, 1024 }
  0x25   :  { %s53_s10 = sshll.u32 %s710_s9, 4  ;;  %p633_p2 = scmp.ne.s32.totalorder %s883_s5, %s632_s13  ;;  %s54_s10 = int_to_ptr.vmem [resolvable:$true] %s53_s10 }
  0x26   :  { %p636_p3 = scmp.lt.u32.totalorder %s632_s13, %s883_s5 }
  0x28   :  { %p638_p4 = pnand %p636_p3, %p633_p2 }
  0x2a   :  { %641 = shalt.err (!%p638_p4)
}
  0x2b   :  { %s642_s20 = scalar_lea.vmem %s54_s10, 1024  ;;  %p647_p6 = scmp.lt.s32.totalorder %s54_s10, %s54_s10 }
  0x2c   :  { %p643_p5 = scmp.ne.s32.totalorder %s54_s10, %s642_s20  ;;  %p648_p7 = scmp.lt.s32.totalorder %s642_s20, %s642_s20 }
  0x2e   :  { %p649_p8 = por %p648_p7, %p647_p6 }
  0x30   :  { %p650_p9 = pnand %p649_p8, %p643_p5 }
  0x32   :  { %653 = shalt.err (!%p650_p9)
}
  0x33   :  { %59 = dma.hbm_to_vmem [thread:$0]  %s883_s5, 1024, %s54_s10, [#allocation6], %s708_s17, %s708_s17, %s709_s18  }
  0x34   :  { %698 = dma.done.wait [#allocation3], 1024  }
  0x35   :  { %699 = vsyncadd [#allocation3], 4294966272 }
  0x36   :  { %700 = dma.done.wait [#allocation6], 2048  }
  0x37   :  { %701 = vsyncadd [#allocation6], 4294965248  ;;  %v711_v0 = vmov 0.0   ;;  %vm712_vm0 = vmmov 0   ;;  %v564_v1 = vld [vmem:[#allocation2] sm:$0xff]   ;;  %v565_v2 = vld [vmem:[#allocation2 + $0x8] sm:$0xff]  }
  0x38   :  { %495 = vmatprep.subr.bf16.mxu0 %v711_v0  ;;  %511 = vmatprep.mubr.msk.bf16.mxu0 %vm712_vm0, %v711_v0  ;;  %v566_v3 = vld [vmem:[#allocation2 + $0x10] sm:$0xff]   ;;  %v572_v4 = vld [vmem:[#allocation5] sm:$0xff]   ;;  %v567_v5 = vld [vmem:[#allocation2 + $0x18] sm:$0xff]  }
  0x39   :  { %515 = vmatprep.subr.bf16.mxu1 %v711_v0  ;;  %531 = vmatprep.mubr.msk.bf16.mxu1 %vm712_vm0, %v711_v0  ;;  %v573_v6 = vld [vmem:[#allocation5 + $0x8] sm:$0xff]   ;;  %v568_v7 = vld [vmem:[#allocation2 + $0x20] sm:$0xff]   ;;  %v574_v8 = vld [vmem:[#allocation5 + $0x10] sm:$0xff]  }
  0x3a   :  { %496 = vmatpush3.bf16.msra.mxu0 %v564_v1  ;;  %516 = vmatpush3.bf16.msra.mxu1 %v572_v4  ;;  %v569_v9 = vld [vmem:[#allocation2 + $0x28] sm:$0xff]   ;;  %v575_v10 = vld [vmem:[#allocation5 + $0x18] sm:$0xff]   ;;  %v570_v11 = vld [vmem:[#allocation2 + $0x30] sm:$0xff]  }
  0x3b   :  { %497 = vmatprep.subr.bf16.mxu0 %v711_v0  ;;  %517 = vmatprep.subr.bf16.mxu1 %v711_v0  ;;  %v576_v12 = vld [vmem:[#allocation5 + $0x20] sm:$0xff]   ;;  %v571_v13 = vld [vmem:[#allocation2 + $0x38] sm:$0xff]   ;;  %v577_v14 = vld [vmem:[#allocation5 + $0x28] sm:$0xff]  }
  0x3c   :  { %v72_v15 = vld [vmem:[%s878_s0] sm:$0xf]  ;;  %v578_v16 = vld [vmem:[#allocation5 + $0x30] sm:$0xff]   ;;  %v579_v17 = vld [vmem:[#allocation5 + $0x38] sm:$0xff]  }
  0x3d   :  { %v580_v18 = vld [vmem:[#allocation7] sm:$0xff]   ;;  %v581_v19 = vld [vmem:[#allocation7 + $0x8] sm:$0xff]   ;;  %v582_v20 = vld [vmem:[#allocation7 + $0x10] sm:$0xff]  }
  0x3e   :  { %498 = vmatpush3.bf16.msra.mxu0 %v565_v2  ;;  %518 = vmatpush3.bf16.msra.mxu1 %v573_v6  ;;  %v583_v21 = vld [vmem:[#allocation7 + $0x18] sm:$0xff]   ;;  %v584_v22 = vld [vmem:[#allocation7 + $0x20] sm:$0xff]   ;;  %v585_v23 = vld [vmem:[#allocation7 + $0x28] sm:$0xff]  }
  0x3f   :  { %499 = vmatprep.subr.bf16.mxu0 %v711_v0  ;;  %519 = vmatprep.subr.bf16.mxu1 %v711_v0  ;;  %v586_v24 = vld [vmem:[#allocation7 + $0x30] sm:$0xff]   ;;  %v441_v25 = vld [vmem:[%s880_s2] ss:$0 sm:$0xff]  ;;  %v587_v33 = vld [vmem:[#allocation7 + $0x38] sm:$0xff]   ;;  %s713_s2 = smov [#allocation9]  }
  0x40   :  { %v450_v34 = vld [vmem:[%s882_s4] ss:$0 sm:$0xff]  ;;  %s427_s23 = sshll.u32 %s713_s2, 4  ;;  %s428_s23 = int_to_ptr.vmem [resolvable:$true] %s427_s23 }
  0x41   :  { %s654_s24 = scalar_lea.vmem %s428_s23, 128  ;;  %p659_p11 = scmp.lt.s32.totalorder %s428_s23, %s428_s23 }
  0x42   :  { %500 = vmatpush3.bf16.msra.mxu0 %v566_v3  ;;  %520 = vmatpush3.bf16.msra.mxu1 %v574_v8  ;;  %p655_p10 = scmp.ne.s32.totalorder %s428_s23, %s654_s24  ;;  %p660_p12 = scmp.lt.s32.totalorder %s654_s24, %s654_s24 }
  0x43   :  { %501 = vmatprep.subr.bf16.mxu0 %v711_v0  ;;  %521 = vmatprep.subr.bf16.mxu1 %v711_v0 }
  0x44   :  { %p661_p13 = por %p660_p12, %p659_p11 }
  0x46   :  { %502 = vmatpush3.bf16.msra.mxu0 %v567_v5  ;;  %522 = vmatpush3.bf16.msra.mxu1 %v575_v10  ;;  %p662_p0 = pnand %p661_p13, %p655_p10 }
  0x47   :  { %503 = vmatprep.subr.bf16.mxu0 %v711_v0  ;;  %523 = vmatprep.subr.bf16.mxu1 %v711_v0 }
  0x4a   :  { %504 = vmatpush3.bf16.msra.mxu0 %v568_v7  ;;  %524 = vmatpush3.bf16.msra.mxu1 %v576_v12 }
  0x4b   :  { %505 = vmatprep.subr.bf16.mxu0 %v711_v0  ;;  %525 = vmatprep.subr.bf16.mxu1 %v711_v0 }
  0x4e   :  { %506 = vmatpush3.bf16.msra.mxu0 %v569_v9  ;;  %526 = vmatpush3.bf16.msra.mxu1 %v577_v14 }
  0x4f   :  { %507 = vmatprep.subr.bf16.mxu0 %v711_v0  ;;  %527 = vmatprep.subr.bf16.mxu1 %v711_v0 }
  0x52   :  { %508 = vmatpush3.bf16.msra.mxu0 %v570_v11  ;;  %528 = vmatpush3.bf16.msra.mxu1 %v578_v16 }
  0x53   :  { %509 = vmatprep.subr.bf16.mxu0 %v711_v0  ;;  %529 = vmatprep.subr.bf16.mxu1 %v711_v0 }
  0x56   :  { %510 = vmatpush3.bf16.msra.mxu0 %v571_v13  ;;  %530 = vmatpush3.bf16.msra.mxu1 %v579_v17 }
  0x57   :  { %535 = vmatprep.subr.bf16.mxu0 %v711_v0 }
  0x59   :  { %512 = vmatmul.mubr.bf16.vlgmr.msra.gmra.mrb[0].mxu0 %v72_v15 }
  0x5a   :  { %551 = vmatprep.mubr.msk.bf16.mxu0 %vm712_vm0, %v711_v0  ;;  %536 = vmatpush3.bf16.msra.mxu0 %v580_v18 }
  0x5b   :  { %537 = vmatprep.subr.bf16.mxu0 %v711_v0 }
  0x5e   :  { %538 = vmatpush3.bf16.msra.mxu0 %v581_v19 }
  0x5f   :  { %539 = vmatprep.subr.bf16.mxu0 %v711_v0 }
  0x62   :  { %540 = vmatpush3.bf16.msra.mxu0 %v582_v20 }
  0x63   :  { %541 = vmatprep.subr.bf16.mxu0 %v711_v0 }
  0x66   :  { %542 = vmatpush3.bf16.msra.mxu0 %v583_v21 }
  0x67   :  { %543 = vmatprep.subr.bf16.mxu0 %v711_v0 }
  0x6a   :  { %544 = vmatpush3.bf16.msra.mxu0 %v584_v22 }
  0x6b   :  { %545 = vmatprep.subr.bf16.mxu0 %v711_v0 }
  0x6e   :  { %546 = vmatpush3.bf16.msra.mxu0 %v585_v23 }
  0x6f   :  { %547 = vmatprep.subr.bf16.mxu0 %v711_v0 }
  0x72   :  { %548 = vmatpush3.bf16.msra.mxu0 %v586_v24 }
  0x73   :  { %549 = vmatprep.subr.bf16.mxu0 %v711_v0 }
  0x76   :  { %550 = vmatpush3.bf16.msra.mxu0 %v587_v33 }
 0x12c   :  { %v178_v26 = vpop.f32.mrb[0].mxu0 }
 0x12d   :  { %v179_v27 = vadd.f32 %v441_v25, %v178_v26  ;;  %v513_v28 = vpop.f32.mrb[1].mxu0 }
 0x12e   :  { %v181_v29 = vpop.f32.mrb[2].mxu0 }
 0x12f   :  { %v184_v30 = vmax.f32 %v179_v27, 0.0  ;;  %v514_v31 = vpop.f32.mrb[3].mxu0 }
 0x131   :  { %v185_v32 = vpack.c.bf16 %v184_v30, %v184_v30 }
 0x133   :  { %532 = vmatmul.mubr.bf16.vlgmr.msra.gmra.mrb[0].mxu1 %v185_v32 }
 0x206   :  { %v291_v35 = vpop.f32.mrb[0].mxu1 }
 0x207   :  { %v292_v36 = vadd.f32 %v450_v34, %v291_v35  ;;  %v533_v37 = vpop.f32.mrb[1].mxu1 }
 0x208   :  { %v294_v38 = vpop.f32.mrb[2].mxu1 }
 0x209   :  { %v298_v39 = vpack.c.bf16 %v292_v36, %v292_v36  ;;  %297 = vst [vmem:[#allocation9] sm:$0xff] %v292_v36  ;;  %v534_v40 = vpop.f32.mrb[3].mxu1 }
 0x20b   :  { %552 = vmatmul.mubr.bf16.vlgmr.msra.gmra.mrb[4].mxu0 %v298_v39 }
 0x20c   :  { %665 = shalt.err (!%p662_p0)
}
 0x20d   :  { %s666_s26 = scalar_lea.hbm %s886_s8, 128 }
 0x20e   :  { %p667_p1 = scmp.ne.s32.totalorder %s886_s8, %s666_s26  ;;  %p670_p2 = scmp.lt.u32.totalorder %s666_s26, %s886_s8 }
 0x210   :  { %p672_p3 = pnand %p670_p2, %p667_p1 }
 0x212   :  { %675 = shalt.err (!%p672_p3)
}
 0x213   :  { %430 = dma.vmem_to_hbm [thread:$0]  %s428_s23, 128, %s886_s8, [#allocation10]   ;;  %v459_v41 = vld [vmem:[%s884_s6] ss:$0 sm:$0xff] }
 0x214   :  { %s714_s13 = smov [#allocation8]  }
 0x215   :  { %s417_s14 = sshll.u32 %s714_s13, 4  ;;  %s418_s14 = int_to_ptr.vmem [resolvable:$true] %s417_s14 }
 0x216   :  { %s676_s15 = scalar_lea.vmem %s418_s14, 128  ;;  %p681_p5 = scmp.lt.s32.totalorder %s418_s14, %s418_s14 }
 0x217   :  { %p677_p4 = scmp.ne.s32.totalorder %s418_s14, %s676_s15  ;;  %p682_p6 = scmp.lt.s32.totalorder %s676_s15, %s676_s15 }
 0x219   :  { %p683_p7 = por %p682_p6, %p681_p5 }
 0x21b   :  { %p684_p8 = pnand %p683_p7, %p677_p4 }
 0x2de   :  { %v404_v42 = vpop.f32.mrb[4].mxu0 }
 0x2df   :  { %v405_v43 = vadd.f32 %v459_v41, %v404_v42  ;;  %v553_v44 = vpop.f32.mrb[5].mxu0 }
 0x2e0   :  { %v407_v45 = vpop.f32.mrb[6].mxu0 }
 0x2e1   :  { %410 = vst [vmem:[#allocation8] sm:$0xff] %v405_v43  ;;  %v554_v46 = vpop.f32.mrb[7].mxu0 }
 0x2e2   :  { %687 = shalt.err (!%p684_p8)
}
 0x2e3   :  { %s688_s6 = scalar_lea.hbm %s885_s7, 128 }
 0x2e4   :  { %p689_p9 = scmp.ne.s32.totalorder %s885_s7, %s688_s6  ;;  %p692_p10 = scmp.lt.u32.totalorder %s688_s6, %s885_s7 }
 0x2e6   :  { %p694_p11 = pnand %p692_p10, %p689_p9 }
 0x2e8   :  { %697 = shalt.err (!%p694_p11)
}
 0x2e9   :  { %420 = dma.vmem_to_hbm [thread:$0]  %s418_s14, 128, %s885_s7, [#allocation4]  }
 0x2ea   :  { %702 = dma.done.wait [#allocation4], 128  }
 0x2eb   :  { %703 = vsyncadd [#allocation4], 4294967168 }
 0x2ec   :  { %704 = dma.done.wait [#allocation10], 128  }
 0x2ed   :  { %705 = vsyncadd [#allocation10], 4294967168 }
 0x2ee   :  { %437 = vsyncpa [#allocation3], 1 }
 0x2ef   :  { %438 = vsyncpa [#allocation6], 1 }
 0x2f0   :  { %439 = vsyncpa [#allocation4], 1 }
 0x2f1   :  { %440 = vsyncpa [#allocation10], 1 }

// kernel: _ae_forward_impl.1
= control target key start
LH: loop header
LB: loop body
LE: loop exit
PB: predicated region body
PF: predicated region fallthrough
CT: control target
= control target key end

     0   :  { %14 = vsyncpa [#allocation3], 0  ;;  %s878_s0 = inlined_call_operand.vmem [shape: bf16[8,128], index: 0, kind: input, shape index: {}]   ;;  %s879_s1 = inlined_call_operand.hbm [shape: bf16[128,128], index: 1, kind: input, shape index: {}]   ;;  %s880_s2 = inlined_call_operand.vmem [shape: f32[1,128], index: 2, kind: input, shape index: {}]   ;;  %s881_s3 = inlined_call_operand.hbm [shape: bf16[128,128], index: 3, kind: input, shape index: {}]   ;;  %s882_s4 = inlined_call_operand.vmem [shape: f32[1,128], index: 4, kind: input, shape index: {}]   ;;  %s883_s5 = inlined_call_operand.hbm [shape: bf16[128,128], index: 5, kind: input, shape index: {}]   ;;  %s884_s6 = inlined_call_operand.vmem [shape: f32[1,128], index: 6, kind: input, shape index: {}]   ;;  %s885_s7 = inlined_call_operand.hbm [shape: f32[8,128], index: 7, kind: output, shape index: {0}]   ;;  %s886_s8 = inlined_call_operand.hbm [shape: f32[8,128], index: 8, kind: output, shape index: {1}]  }
   0x1   :  { %15 = vsyncpa [#allocation6], 0 }
   0x2   :  { %16 = vsyncpa [#allocation4], 0 }
   0x3   :  { %17 = vsyncpa [#allocation10], 0  ;;  %s706_s27 = smov [#allocation5]   ;;  %s707_s29 = smov [#allocation2]  }
   0x4   :  { %s39_s28 = sshll.u32 %s706_s27, 4  ;;  %s25_s30 = sshll.u32 %s707_s29, 4  ;;  %s40_s28 = int_to_ptr.vmem [resolvable:$true] %s39_s28  ;;  %s760_s30 = int_to_ptr.vmem [resolvable:$true] %s25_s30 }
   0x5   :  { %s588_s11 = scalar_lea.hbm %s881_s3, 1024 }
   0x6   :  { %p589_p0 = scmp.ne.s32.totalorder %s881_s3, %s588_s11  ;;  %p592_p1 = scmp.lt.u32.totalorder %s588_s11, %s881_s3 }
   0x8   :  { %p594_p2 = pnand %p592_p1, %p589_p0 }
   0xa   :  { %597 = shalt.err (!%p594_p2)
}
   0xb   :  { %s598_s16 = scalar_lea.vmem %s40_s28, 1024  ;;  %p603_p4 = scmp.lt.s32.totalorder %s40_s28, %s40_s28 }
   0xc   :  { %p599_p3 = scmp.ne.s32.totalorder %s40_s28, %s598_s16  ;;  %p604_p5 = scmp.lt.s32.totalorder %s598_s16, %s598_s16 }
   0xe   :  { %p605_p6 = por %p604_p5, %p603_p4 }
  0x10   :  { %p606_p7 = pnand %p605_p6, %p599_p3 }
  0x12   :  { %609 = shalt.err (!%p606_p7)
}
  0x13   :  { %s708_s17 = smov 64   ;;  %s709_s18 = smov 4  }
  0x14   :  { %45 = dma.hbm_to_vmem [thread:$0]  %s881_s3, 1024, %s40_s28, [#allocation6], %s708_s17, %s708_s17, %s709_s18  }
  0x15   :  { %s610_s23 = scalar_lea.hbm %s879_s1, 1024 }
  0x16   :  { %p611_p8 = scmp.ne.s32.totalorder %s879_s1, %s610_s23  ;;  %p614_p9 = scmp.lt.u32.totalorder %s610_s23, %s879_s1 }
  0x18   :  { %p616_p10 = pnand %p614_p9, %p611_p8 }
  0x1a   :  { %619 = shalt.err (!%p616_p10)
}
  0x1b   :  { %s620_s29 = scalar_lea.vmem %s760_s30, 1024  ;;  %p625_p12 = scmp.lt.s32.totalorder %s760_s30, %s760_s30 }
  0x1c   :  { %p621_p11 = scmp.ne.s32.totalorder %s760_s30, %s620_s29  ;;  %p626_p13 = scmp.lt.s32.totalorder %s620_s29, %s620_s29 }
  0x1e   :  { %p627_p0 = por %p626_p13, %p625_p12 }
  0x20   :  { %p628_p1 = pnand %p627_p0, %p621_p11 }
  0x22   :  { %631 = shalt.err (!%p628_p1)
}
  0x23   :  { %31 = dma.hbm_to_vmem [thread:$0]  %s879_s1, 1024, %s760_s30, [#allocation3], %s708_s17, %s708_s17, %s709_s18  }
  0x24   :  { %s710_s9 = smov [#allocation7]   ;;  %s632_s13 = scalar_lea.hbm %s883_s5, 1024 }
  0x25   :  { %s53_s10 = sshll.u32 %s710_s9, 4  ;;  %p633_p2 = scmp.ne.s32.totalorder %s883_s5, %s632_s13  ;;  %s54_s10 = int_to_ptr.vmem [resolvable:$true] %s53_s10 }
  0x26   :  { %p636_p3 = scmp.lt.u32.totalorder %s632_s13, %s883_s5 }
  0x28   :  { %p638_p4 = pnand %p636_p3, %p633_p2 }
  0x2a   :  { %641 = shalt.err (!%p638_p4)
}
  0x2b   :  { %s642_s20 = scalar_lea.vmem %s54_s10, 1024  ;;  %p647_p6 = scmp.lt.s32.totalorder %s54_s10, %s54_s10 }
  0x2c   :  { %p643_p5 = scmp.ne.s32.totalorder %s54_s10, %s642_s20  ;;  %p648_p7 = scmp.lt.s32.totalorder %s642_s20, %s642_s20 }
  0x2e   :  { %p649_p8 = por %p648_p7, %p647_p6 }
  0x30   :  { %p650_p9 = pnand %p649_p8, %p643_p5 }
  0x32   :  { %653 = shalt.err (!%p650_p9)
}
  0x33   :  { %59 = dma.hbm_to_vmem [thread:$0]  %s883_s5, 1024, %s54_s10, [#allocation6], %s708_s17, %s708_s17, %s709_s18  }
  0x34   :  { %698 = dma.done.wait [#allocation3], 1024  }
  0x35   :  { %699 = vsyncadd [#allocation3], 4294966272 }
  0x36   :  { %700 = dma.done.wait [#allocation6], 2048  }
  0x37   :  { %701 = vsyncadd [#allocation6], 4294965248  ;;  %v711_v0 = vmov 0.0   ;;  %vm712_vm0 = vmmov 0   ;;  %v564_v1 = vld [vmem:[#allocation2] sm:$0xff]   ;;  %v565_v2 = vld [vmem:[#allocation2 + $0x8] sm:$0xff]  }
  0x38   :  { %495 = vmatprep.subr.bf16.mxu0 %v711_v0  ;;  %511 = vmatprep.mubr.msk.bf16.mxu0 %vm712_vm0, %v711_v0  ;;  %v566_v3 = vld [vmem:[#allocation2 + $0x10] sm:$0xff]   ;;  %v572_v4 = vld [vmem:[#allocation5] sm:$0xff]   ;;  %v567_v5 = vld [vmem:[#allocation2 + $0x18] sm:$0xff]  }
  0x39   :  { %515 = vmatprep.subr.bf16.mxu1 %v711_v0  ;;  %531 = vmatprep.mubr.msk.bf16.mxu1 %vm712_vm0, %v711_v0  ;;  %v573_v6 = vld [vmem:[#allocation5 + $0x8] sm:$0xff]   ;;  %v568_v7 = vld [vmem:[#allocation2 + $0x20] sm:$0xff]   ;;  %v574_v8 = vld [vmem:[#allocation5 + $0x10] sm:$0xff]  }
  0x3a   :  { %496 = vmatpush3.bf16.msra.mxu0 %v564_v1  ;;  %516 = vmatpush3.bf16.msra.mxu1 %v572_v4  ;;  %v569_v9 = vld [vmem:[#allocation2 + $0x28] sm:$0xff]   ;;  %v575_v10 = vld [vmem:[#allocation5 + $0x18] sm:$0xff]   ;;  %v570_v11 = vld [vmem:[#allocation2 + $0x30] sm:$0xff]  }
  0x3b   :  { %497 = vmatprep.subr.bf16.mxu0 %v711_v0  ;;  %517 = vmatprep.subr.bf16.mxu1 %v711_v0  ;;  %v576_v12 = vld [vmem:[#allocation5 + $0x20] sm:$0xff]   ;;  %v571_v13 = vld [vmem:[#allocation2 + $0x38] sm:$0xff]   ;;  %v577_v14 = vld [vmem:[#allocation5 + $0x28] sm:$0xff]  }
  0x3c   :  { %v72_v15 = vld [vmem:[%s878_s0] sm:$0xf]  ;;  %v578_v16 = vld [vmem:[#allocation5 + $0x30] sm:$0xff]   ;;  %v579_v17 = vld [vmem:[#allocation5 + $0x38] sm:$0xff]  }
  0x3d   :  { %v580_v18 = vld [vmem:[#allocation7] sm:$0xff]   ;;  %v581_v19 = vld [vmem:[#allocation7 + $0x8] sm:$0xff]   ;;  %v582_v20 = vld [vmem:[#allocation7 + $0x10] sm:$0xff]  }
  0x3e   :  { %498 = vmatpush3.bf16.msra.mxu0 %v565_v2  ;;  %518 = vmatpush3.bf16.msra.mxu1 %v573_v6  ;;  %v583_v21 = vld [vmem:[#allocation7 + $0x18] sm:$0xff]   ;;  %v584_v22 = vld [vmem:[#allocation7 + $0x20] sm:$0xff]   ;;  %v585_v23 = vld [vmem:[#allocation7 + $0x28] sm:$0xff]  }
  0x3f   :  { %499 = vmatprep.subr.bf16.mxu0 %v711_v0  ;;  %519 = vmatprep.subr.bf16.mxu1 %v711_v0  ;;  %v586_v24 = vld [vmem:[#allocation7 + $0x30] sm:$0xff]   ;;  %v441_v25 = vld [vmem:[%s880_s2] ss:$0 sm:$0xff]  ;;  %v587_v33 = vld [vmem:[#allocation7 + $0x38] sm:$0xff]   ;;  %s713_s2 = smov [#allocation9]  }
  0x40   :  { %v450_v34 = vld [vmem:[%s882_s4] ss:$0 sm:$0xff]  ;;  %s427_s23 = sshll.u32 %s713_s2, 4  ;;  %s428_s23 = int_to_ptr.vmem [resolvable:$true] %s427_s23 }
  0x41   :  { %s654_s24 = scalar_lea.vmem %s428_s23, 128  ;;  %p659_p11 = scmp.lt.s32.totalorder %s428_s23, %s428_s23 }
  0x42   :  { %500 = vmatpush3.bf16.msra.mxu0 %v566_v3  ;;  %520 = vmatpush3.bf16.msra.mxu1 %v574_v8  ;;  %p655_p10 = scmp.ne.s32.totalorder %s428_s23, %s654_s24  ;;  %p660_p12 = scmp.lt.s32.totalorder %s654_s24, %s654_s24 }
  0x43   :  { %501 = vmatprep.subr.bf16.mxu0 %v711_v0  ;;  %521 = vmatprep.subr.bf16.mxu1 %v711_v0 }
  0x44   :  { %p661_p13 = por %p660_p12, %p659_p11 }
  0x46   :  { %502 = vmatpush3.bf16.msra.mxu0 %v567_v5  ;;  %522 = vmatpush3.bf16.msra.mxu1 %v575_v10  ;;  %p662_p0 = pnand %p661_p13, %p655_p10 }
  0x47   :  { %503 = vmatprep.subr.bf16.mxu0 %v711_v0  ;;  %523 = vmatprep.subr.bf16.mxu1 %v711_v0 }
  0x4a   :  { %504 = vmatpush3.bf16.msra.mxu0 %v568_v7  ;;  %524 = vmatpush3.bf16.msra.mxu1 %v576_v12 }
  0x4b   :  { %505 = vmatprep.subr.bf16.mxu0 %v711_v0  ;;  %525 = vmatprep.subr.bf16.mxu1 %v711_v0 }
  0x4e   :  { %506 = vmatpush3.bf16.msra.mxu0 %v569_v9  ;;  %526 = vmatpush3.bf16.msra.mxu1 %v577_v14 }
  0x4f   :  { %507 = vmatprep.subr.bf16.mxu0 %v711_v0  ;;  %527 = vmatprep.subr.bf16.mxu1 %v711_v0 }
  0x52   :  { %508 = vmatpush3.bf16.msra.mxu0 %v570_v11  ;;  %528 = vmatpush3.bf16.msra.mxu1 %v578_v16 }
  0x53   :  { %509 = vmatprep.subr.bf16.mxu0 %v711_v0  ;;  %529 = vmatprep.subr.bf16.mxu1 %v711_v0 }
  0x56   :  { %510 = vmatpush3.bf16.msra.mxu0 %v571_v13  ;;  %530 = vmatpush3.bf16.msra.mxu1 %v579_v17 }
  0x57   :  { %535 = vmatprep.subr.bf16.mxu0 %v711_v0 }
  0x59   :  { %512 = vmatmul.mubr.bf16.vlgmr.msra.gmra.mrb[0].mxu0 %v72_v15 }
  0x5a   :  { %551 = vmatprep.mubr.msk.bf16.mxu0 %vm712_vm0, %v711_v0  ;;  %536 = vmatpush3.bf16.msra.mxu0 %v580_v18 }
  0x5b   :  { %537 = vmatprep.subr.bf16.mxu0 %v711_v0 }
  0x5e   :  { %538 = vmatpush3.bf16.msra.mxu0 %v581_v19 }
  0x5f   :  { %539 = vmatprep.subr.bf16.mxu0 %v711_v0 }
  0x62   :  { %540 = vmatpush3.bf16.msra.mxu0 %v582_v20 }
  0x63   :  { %541 = vmatprep.subr.bf16.mxu0 %v711_v0 }
  0x66   :  { %542 = vmatpush3.bf16.msra.mxu0 %v583_v21 }
  0x67   :  { %543 = vmatprep.subr.bf16.mxu0 %v711_v0 }
  0x6a   :  { %544 = vmatpush3.bf16.msra.mxu0 %v584_v22 }
  0x6b   :  { %545 = vmatprep.subr.bf16.mxu0 %v711_v0 }
  0x6e   :  { %546 = vmatpush3.bf16.msra.mxu0 %v585_v23 }
  0x6f   :  { %547 = vmatprep.subr.bf16.mxu0 %v711_v0 }
  0x72   :  { %548 = vmatpush3.bf16.msra.mxu0 %v586_v24 }
  0x73   :  { %549 = vmatprep.subr.bf16.mxu0 %v711_v0 }
  0x76   :  { %550 = vmatpush3.bf16.msra.mxu0 %v587_v33 }
 0x12c   :  { %v178_v26 = vpop.f32.mrb[0].mxu0 }
 0x12d   :  { %v179_v27 = vadd.f32 %v441_v25, %v178_v26  ;;  %v513_v28 = vpop.f32.mrb[1].mxu0 }
 0x12e   :  { %v181_v29 = vpop.f32.mrb[2].mxu0 }
 0x12f   :  { %v184_v30 = vmax.f32 %v179_v27, 0.0  ;;  %v514_v31 = vpop.f32.mrb[3].mxu0 }
 0x131   :  { %v185_v32 = vpack.c.bf16 %v184_v30, %v184_v30 }
 0x133   :  { %532 = vmatmul.mubr.bf16.vlgmr.msra.gmra.mrb[0].mxu1 %v185_v32 }
 0x206   :  { %v291_v35 = vpop.f32.mrb[0].mxu1 }
 0x207   :  { %v292_v36 = vadd.f32 %v450_v34, %v291_v35  ;;  %v533_v37 = vpop.f32.mrb[1].mxu1 }
 0x208   :  { %v294_v38 = vpop.f32.mrb[2].mxu1 }
 0x209   :  { %v298_v39 = vpack.c.bf16 %v292_v36, %v292_v36  ;;  %297 = vst [vmem:[#allocation9] sm:$0xff] %v292_v36  ;;  %v534_v40 = vpop.f32.mrb[3].mxu1 }
 0x20b   :  { %552 = vmatmul.mubr.bf16.vlgmr.msra.gmra.mrb[4].mxu0 %v298_v39 }
 0x20c   :  { %665 = shalt.err (!%p662_p0)
}
 0x20d   :  { %s666_s26 = scalar_lea.hbm %s886_s8, 128 }
 0x20e   :  { %p667_p1 = scmp.ne.s32.totalorder %s886_s8, %s666_s26  ;;  %p670_p2 = scmp.lt.u32.totalorder %s666_s26, %s886_s8 }
 0x210   :  { %p672_p3 = pnand %p670_p2, %p667_p1 }
 0x212   :  { %675 = shalt.err (!%p672_p3)
}
 0x213   :  { %430 = dma.vmem_to_hbm [thread:$0]  %s428_s23, 128, %s886_s8, [#allocation10]   ;;  %v459_v41 = vld [vmem:[%s884_s6] ss:$0 sm:$0xff] }
 0x214   :  { %s714_s13 = smov [#allocation8]  }
 0x215   :  { %s417_s14 = sshll.u32 %s714_s13, 4  ;;  %s418_s14 = int_to_ptr.vmem [resolvable:$true] %s417_s14 }
 0x216   :  { %s676_s15 = scalar_lea.vmem %s418_s14, 128  ;;  %p681_p5 = scmp.lt.s32.totalorder %s418_s14, %s418_s14 }
 0x217   :  { %p677_p4 = scmp.ne.s32.totalorder %s418_s14, %s676_s15  ;;  %p682_p6 = scmp.lt.s32.totalorder %s676_s15, %s676_s15 }
 0x219   :  { %p683_p7 = por %p682_p6, %p681_p5 }
 0x21b   :  { %p684_p8 = pnand %p683_p7, %p677_p4 }
 0x2de   :  { %v404_v42 = vpop.f32.mrb[4].mxu0 }
 0x2df   :  { %v405_v43 = vadd.f32 %v459_v41, %v404_v42  ;;  %v553_v44 = vpop.f32.mrb[5].mxu0 }
 0x2e0   :  { %v407_v45 = vpop.f32.mrb[6].mxu0 }
 0x2e1   :  { %410 = vst [vmem:[#allocation8] sm:$0xff] %v405_v43  ;;  %v554_v46 = vpop.f32.mrb[7].mxu0 }
 0x2e2   :  { %687 = shalt.err (!%p684_p8)
}
 0x2e3   :  { %s688_s6 = scalar_lea.hbm %s885_s7, 128 }
 0x2e4   :  { %p689_p9 = scmp.ne.s32.totalorder %s885_s7, %s688_s6  ;;  %p692_p10 = scmp.lt.u32.totalorder %s688_s6, %s885_s7 }
 0x2e6   :  { %p694_p11 = pnand %p692_p10, %p689_p9 }
 0x2e8   :  { %697 = shalt.err (!%p694_p11)
}
 0x2e9   :  { %420 = dma.vmem_to_hbm [thread:$0]  %s418_s14, 128, %s885_s7, [#allocation4]  }
 0x2ea   :  { %702 = dma.done.wait [#allocation4], 128  }
 0x2eb   :  { %703 = vsyncadd [#allocation4], 4294967168 }
 0x2ec   :  { %704 = dma.done.wait [#allocation10], 128  }
 0x2ed   :  { %705 = vsyncadd [#allocation10], 4294967168 }
 0x2ee   :  { %437 = vsyncpa [#allocation3], 1 }
 0x2ef   :  { %438 = vsyncpa [#allocation6], 1 }
 0x2f0   :  { %439 = vsyncpa [#allocation4], 1 }
 0x2f1   :  { %440 = vsyncpa [#allocation10], 1 }

</bundles_post_ra>
